<compile_context>
chip_gen: v5e
topology: v5e:2x2
jax: 0.10.0
libtpu: 0.0.40
codegen_flags: <defaults>
</compile_context>

<pallas_src>
import jax
import jax.numpy as jnp
from jax import lax
from jax.experimental import pallas as pl
from jax.experimental.pallas import tpu as pltpu


# ----------------------------------------------------------------------------
# helpers
# ----------------------------------------------------------------------------
def _round_up(x, m):
    return ((x + m - 1) // m) * m


def _min_sublane(dtype):
    """Dtype-aware second-minor alignment: 8 for f32, 16 for bf16, 32 for int8."""
    itemsize = jnp.dtype(dtype).itemsize
    return max(8, 32 // itemsize)


def _pick_tile(dim, candidates):
    """Pick candidate tile minimizing padded size; ties broken by larger tile."""
    best_c, best_pad = None, None
    for c in candidates:
        pad = _round_up(dim, c)
        if best_pad is None or pad < best_pad or (pad == best_pad and c > best_c):
            best_c, best_pad = c, pad
    return best_c


def _pick_tn(out_features):
    if out_features <= 128:
        return 128
    if out_features <= 256:
        return 256
    # multiples of 256 keep the 2x256x256 MXU (v6e/v7x) at full width.
    return _pick_tile(out_features, (256, 512))


def _pick_tk(in_features):
    if in_features <= 1024:
        return _round_up(in_features, 128)
    return _pick_tile(in_features, (512, 1024))


# ----------------------------------------------------------------------------
# kernels
# ----------------------------------------------------------------------------
def _small_linear_kernel(x_ref, w_ref, b_ref, o_ref):
    """Single-block path: whole problem in one VMEM tile."""
    acc = jnp.dot(x_ref[...], w_ref[...], preferred_element_type=jnp.float32)
    o_ref[...] = (acc + b_ref[...]).astype(o_ref.dtype)


def _make_tiled_kernel(in_features, tk, need_k_mask):
    """(tm, tn) output tile, K innermost reduction, f32 resident accumulator."""

    def kernel(x_ref, w_ref, b_ref, o_ref, acc_ref):
        k = pl.program_id(2)

        @pl.when(k == 0)
        def _():
            # Fold the bias into the accumulator init (saves an epilogue add).
            acc_ref[...] = jnp.broadcast_to(
                b_ref[...].astype(jnp.float32), acc_ref.shape
            )

        x_tile = x_ref[...]
        if need_k_mask:
            # Only compiled when In % tk != 0: zero the out-of-bounds K columns
            # of the boundary block (boundary block contents are unspecified).
            col = lax.broadcasted_iota(jnp.int32, x_tile.shape, 1)
            x_tile = jnp.where(col < (in_features - k * tk), x_tile, 0)

        # x tile (tm, tk) @ w tile (tk, tn): canonical contraction, no
        # per-step transpose (weight was transposed once at prep time).
        acc_ref[...] += jnp.dot(x_tile, w_ref[...],
                                preferred_element_type=jnp.float32)

        @pl.when(k == pl.num_programs(2) - 1)
        def _():
            o_ref[...] = acc_ref[...].astype(o_ref.dtype)

    return kernel


# ----------------------------------------------------------------------------
# parameter prep (done ONCE, not per forward call)
# ----------------------------------------------------------------------------
def prepare_dnn0_params(weight, bias):
    """weight: (Out, In) PyTorch nn.Linear layout; bias: (Out,)."""
    out_f, in_f = weight.shape
    assert bias.shape == (out_f,)

    tn = _pick_tn(out_f)
    tk = _pick_tk(in_f)
    np_ = _round_up(out_f, tn)
    kp_ = _round_up(in_f, tk)

    w_t = jnp.transpose(weight)                       # (In, Out) -- one-time transpose
    w_pad = jnp.pad(w_t, ((0, kp_ - in_f), (0, np_ - out_f)))   # (Kp, Np), zero K/N pad
    b_row = bias.reshape(1, out_f).astype(jnp.float32)           # small-path bias
    b_pad = jnp.pad(b_row, ((0, 0), (0, np_ - out_f)))           # (1, Np)

    return dict(
        in_features=in_f, out_features=out_f,
        tn=tn, tk=tk,
        w_t=w_t, b_row=b_row,       # unpadded (small-path)
        w_pad=w_pad, b_pad=b_pad,   # padded  (tiled-path)
    )


# ----------------------------------------------------------------------------
# forward
# ----------------------------------------------------------------------------
_SMALL_MACS = 1 << 22       # <= ~4M MACs -> single-block path
_SMALL_ELEMS = 1 << 21      # each operand <= ~2M elements in VMEM


def dnn0_forward(x, params, *, tm_max=512):
    """y = x @ W^T + b with PyTorch nn.Linear semantics.  x: (B, In)."""
    batch, in_f = x.shape
    assert in_f == params["in_features"], "in_features mismatch"
    out_f = params["out_features"]
    itemsize = jnp.dtype(x.dtype).itemsize

    flops = 2 * batch * in_f * out_f
    cost = pl.CostEstimate(
        flops=flops,
        transcendentals=0,
        bytes_accessed=itemsize * (batch * in_f + batch * out_f)
        + itemsize * in_f * out_f + 4 * out_f,
    )

    # ---- small-problem fast path: one full-array block, no pad / no slice.
    if (batch * in_f * out_f <= _SMALL_MACS
            and batch * in_f <= _SMALL_ELEMS
            and in_f * out_f <= _SMALL_ELEMS
            and batch * out_f <= _SMALL_ELEMS):
        return pl.pallas_call(
            _small_linear_kernel,
            out_shape=jax.ShapeDtypeStruct((batch, out_f), x.dtype),
            in_specs=[
                pl.BlockSpec((batch, in_f), lambda: (0, 0)),
                pl.BlockSpec((in_f, out_f), lambda: (0, 0)),
                pl.BlockSpec((1, out_f), lambda: (0, 0)),
            ],
            out_specs=pl.BlockSpec((batch, out_f), lambda: (0, 0)),
            cost_estimate=cost,
        )(x, params["w_t"], params["b_row"])

    # ---- tiled path.
    tn, tk = params["tn"], params["tk"]
    w_pad, b_pad = params["w_pad"], params["b_pad"]
    kp_, np_ = w_pad.shape

    sub = _min_sublane(x.dtype)
    tm = min(tm_max, _round_up(batch, sub))

    grid = (pl.cdiv(batch, tm), np_ // tn, kp_ // tk)
    # TODO(synk): on v7x, a (1, 1, K) grid leaves one of the two TensorCores
    # idle; shrinking tn (or splitting K into two partial sums) would fix it.

    kernel = _make_tiled_kernel(in_f, tk, need_k_mask=(in_f % tk != 0))

    return pl.pallas_call(
        kernel,
        out_shape=jax.ShapeDtypeStruct((batch, out_f), x.dtype),
        grid_spec=pltpu.PrefetchScalarGridSpec(
            num_scalar_prefetch=0,
            grid=grid,
            in_specs=[
                # x: (tm, tk) tile at (i, k); M/K edges handled by masking.
                pl.BlockSpec((tm, tk), lambda i, j, k: (i, k)),
                # weight, pre-transposed+padded to (Kp, Np): (tk, tn) at (k, j).
                pl.BlockSpec((tk, tn), lambda i, j, k: (k, j)),
                # bias (1, Np): (1, tn) at (0, j).
                pl.BlockSpec((1, tn), lambda i, j, k: (0, j)),
            ],
            # Output tile independent of k -> resident accumulator across K.
            out_specs=pl.BlockSpec((tm, tn), lambda i, j, k: (i, j)),
            scratch_shapes=[pltpu.VMEM((tm, tn), jnp.float32)],
        ),
        compiler_params=pltpu.CompilerParams(
            dimension_semantics=("parallel", "parallel", "arbitrary"),
            vmem_limit_bytes=48 * 1024 * 1024,
        ),
        cost_estimate=cost,
    )(x, w_pad, b_pad)


# ----------------------------------------------------------------------------
# demo / self-test
# ----------------------------------------------------------------------------
if __name__ == "__main__":
    # --- small shape consistent with DNN0(config, inputs, outputs): 8x32 -> 16
    batch, inputs, outputs = 8, 32, 16
    kx, kw, kb = jax.random.split(jax.random.PRNGKey(0), 3)

    bound = 1.0 / (inputs ** 0.5)   # nn.Linear default init range
    weight = jax.random.uniform(kw, (outputs, inputs), jnp.float32, -bound, bound)
    bias = jax.random.uniform(kb, (outputs,), jnp.float32, -bound, bound)
    x = jax.random.normal(kx, (batch, inputs), jnp.float32)

    params = prepare_dnn0_params(weight, bias)
    y = dnn0_forward(x, params)
    jax.block_until_ready(y)

    y_ref = x @ weight.T + bias
    assert y.shape == (batch, outputs)
    assert jnp.allclose(y, y_ref, atol=1e-5, rtol=1e-5)

    # --- medium shape exercising the tiled path (K mask + M/N edge tiles)
    b2, in2, out2 = 260, 1200, 300
    k1, k2, k3 = jax.random.split(jax.random.PRNGKey(1), 3)
    w2 = jax.random.normal(k1, (out2, in2), jnp.float32) * 0.02
    bb2 = jax.random.normal(k2, (out2,), jnp.float32) * 0.02
    x2 = jax.random.normal(k3, (b2, in2), jnp.float32)

    p2 = prepare_dnn0_params(w2, bb2)
    y2 = dnn0_forward(x2, p2)
    jax.block_until_ready(y2)

    y2_ref = jnp.matmul(x2, w2.T, precision=jax.lax.Precision.HIGHEST) + bb2
    assert y2.shape == (b2, out2)
    assert jnp.allclose(y2, y2_ref, atol=2e-3, rtol=2e-3)

    print("KERNEL_OK")
</pallas_src>

<mosaic_0001>
module attributes {stable_mosaic.version = 11 : i64} {
  func.func @_small_linear_kernel(%arg0: memref<8x32xf32, #tpu.memory_space<vmem>>, %arg1: memref<32x16xf32, #tpu.memory_space<vmem>>, %arg2: memref<1x16xf32, #tpu.memory_space<vmem>>, %arg3: memref<8x16xf32, #tpu.memory_space<vmem>>) attributes {dimension_semantics = [], scalar_prefetch = 0 : i64, scratch_operands = 0 : i64, tpu.core_type = #tpu.core_type<tc>} {
    %c0 = arith.constant 0 : index
    %c0_0 = arith.constant 0 : index
    %0 = vector.load %arg0[%c0, %c0_0] : memref<8x32xf32, #tpu.memory_space<vmem>>, vector<8x32xf32>
    %c0_1 = arith.constant 0 : index
    %c0_2 = arith.constant 0 : index
    %1 = vector.load %arg1[%c0_1, %c0_2] : memref<32x16xf32, #tpu.memory_space<vmem>>, vector<32x16xf32>
    %cst = arith.constant dense<0.000000e+00> : vector<8x16xf32>
    %2 = tpu.matmul %0, %1, %cst {dimension_numbers = #tpu.dot_dimension_numbers<[1], [0], [0], [1], [0, 0, 1, 1], [], []>} : vector<8x32xf32>, vector<32x16xf32>, vector<8x16xf32> -> vector<8x16xf32>
    %c0_3 = arith.constant 0 : index
    %c0_4 = arith.constant 0 : index
    %3 = vector.load %arg2[%c0_3, %c0_4] : memref<1x16xf32, #tpu.memory_space<vmem>>, vector<1x16xf32>
    %4 = vector.broadcast %3 : vector<1x16xf32> to vector<8x16xf32>
    %5 = arith.addf %2, %4 : vector<8x16xf32>
    %c0_5 = arith.constant 0 : index
    %c0_6 = arith.constant 0 : index
    %6 = vector.load %arg3[%c0_5, %c0_6] : memref<8x16xf32, #tpu.memory_space<vmem>>, vector<8x16xf32>
    tpu.vector_store %arg3[%c0_5, %c0_6], %5 {strides = array<i32>} : memref<8x16xf32, #tpu.memory_space<vmem>>, vector<8x16xf32>,
    return
  }
}

</mosaic_0001>

<bundles_post_ra>
// kernel: tpu_custom_call.1
= control target key start
LH: loop header
LB: loop body
LE: loop exit
PB: predicated region body
PF: predicated region fallthrough
CT: control target
= control target key end

     0   :  { %s137_s0 = inlined_call_operand.vmem [shape: f32[8,32], index: 0, kind: input, shape index: {}]   ;;  %s138_s1 = inlined_call_operand.vmem [shape: f32[32,16], index: 1, kind: input, shape index: {}]   ;;  %s139_s2 = inlined_call_operand.vmem [shape: f32[1,16], index: 2, kind: input, shape index: {}]   ;;  %s140_s3 = inlined_call_operand.hbm [shape: f32[8,16], index: 3, kind: output, shape index: {}]  }
   0x1   :  { %v19_v0 = vld [vmem:[%s138_s1 + $0x18] sm:$0xff]  ;;  %v18_v1 = vld [vmem:[%s138_s1 + $0x10] sm:$0xff]  ;;  %v17_v2 = vld [vmem:[%s138_s1 + $0x8] sm:$0xff] }
   0x2   :  { %40 = vmatpush.msra.mxu0 %v19_v0 }
   0x3   :  { %8 = vsyncpa [#allocation3], 0  ;;  %v16_v3 = vld [vmem:[%s138_s1] sm:$0xff]  ;;  %vm24_vm0 = vcmask 261120   ;;  %s95_s24 = smov [#allocation2]   ;;  %s57_s28 = sshll.u32 %s140_s3, 4  ;;  %s58_s28 = int_to_ptr.hbm [resolvable:$true] %s57_s28 }
   0x4   :  { %41 = vmatpush.msra.mxu0 %v18_v1  ;;  %v15_v4 = vld [vmem:[%s137_s0] sm:$0xff]  ;;  %s55_s25 = sshll.u32 %s95_s24, 4  ;;  %vm48_vm1 = vcmask 130048   ;;  %s56_s25 = int_to_ptr.vmem [resolvable:$true] %s55_s25 }
   0x5   :  { %v68_v5 = vld [vmem:[%s139_s2] ss:$0 sm:$0xff] }
   0x6   :  { %42 = vmatpush.msra.mxu0 %v17_v2 }
   0x8   :  { %43 = vmatpush.msra.mxu0 %v16_v3 }
   0x9   :  { %66 = vmatmul.msk.f32.vlgmr.msra.gmra.mxu0 %vm24_vm0, %v15_v4 }
  0x86   :  { %v45_v6 = vpop.f32.mrf.mxu0 }
  0x87   :  { %v46_v7 = vadd.f32 %v68_v5, %v45_v6 }
  0x89   :  { %49 = vst.msk [vmem:[#allocation2] sm:$0xff] %vm48_vm1, %v46_v7 }
  0x8a   :  { %60 = dma.vmem_to_hbm [thread:$0]  %s56_s25, 128, %s58_s28, [#allocation3]  }
  0x8b   :  { %93 = dma.done.wait [#allocation3], 128  }
  0x8c   :  { %94 = vsyncadd [#allocation3], 4294967168 }
  0x8d   :  { %65 = vsyncpa [#allocation3], 1 }

</bundles_post_ra>
